<compile_context>
chip_gen: v7x
topology: tpu7x:2x2x1
jax: 0.10.0
libtpu: 0.0.40
codegen_flags: <defaults>
</compile_context>

<pallas_src>
import jax
import jax.numpy as jnp
from jax.experimental import pallas as pl
from jax.experimental.pallas import tpu as pltpu


# ----------------------------------------------------------------------------
# Demo-only Pallas kernel: tiled copy.  Not reachable from EdgePrompt.forward.
# ----------------------------------------------------------------------------
def _copy_kernel(x_ref, o_ref):
    o_ref[...] = x_ref[...]


def _edge_prompt_tiled_copy(x, *, tm: int = 128, tn: int = 128):
    """Tiled, generation-safe copy: lane-dense tiles, parallel grid axes.

    Tile plan (review feedback): each (tm, tn) f32 tile is 64 KiB; with
    2x double-buffering for one input + one output this is ~256 KiB of VMEM,
    orders of magnitude under v7x's 32 MiB scoped default — no whole-array
    VMEM mapping that would OOM on v7x for real-sized edge tensors.
    """
    m, n = x.shape
    assert m % tm == 0 and n % tn == 0, "demo expects tile-aligned shapes"
    grid = (m // tm, n // tn)

    bytes_accessed = 2 * x.size * x.dtype.itemsize  # one read + one write
    return pl.pallas_call(
        _copy_kernel,
        out_shape=jax.ShapeDtypeStruct(x.shape, x.dtype),
        grid=grid,
        in_specs=[pl.BlockSpec((tm, tn), lambda i, j: (i, j))],
        out_specs=pl.BlockSpec((tm, tn), lambda i, j: (i, j)),
        compiler_params=pltpu.CompilerParams(
            dimension_semantics=("parallel", "parallel"),
        ),
        cost_estimate=pl.CostEstimate(
            flops=0, transcendentals=0, bytes_accessed=bytes_accessed
        ),
    )(x)


_edge_prompt_tiled_copy_jit = jax.jit(_edge_prompt_tiled_copy, static_argnames=("tm", "tn"))


# ----------------------------------------------------------------------------
# EdgePrompt — mirrors the (empty) PyTorch module exactly.
# ----------------------------------------------------------------------------
class EdgePrompt:
    def __init__(self, args=None):
        # Reference __init__ registers no parameters.
        pass

    def forward(self, batch_size):
        # Reference forward body is `pass` -> returns None.  No Pallas call is
        # made here: there is nothing to compute, and (per review) a Pallas
        # identity/copy would only add HBM traffic and launch overhead.
        return None

    def __call__(self, batch_size):
        return self.forward(batch_size)


if __name__ == "__main__":
    key = jax.random.PRNGKey(0)

    # Deterministic small input for the demo kernel: 2x2 grid of (128, 128)
    # f32 tiles — lane-dense last dim (multiple of 128), sublane dim a
    # multiple of 8, tiny relative to every generation's VMEM.
    x = jax.random.normal(key, (256, 256), dtype=jnp.float32)

    y = _edge_prompt_tiled_copy_jit(x)
    jax.block_until_ready(y)
    assert y.shape == (256, 256)
    assert y.dtype == jnp.float32
    assert jnp.allclose(y, x)

    # Faithful EdgePrompt forward: returns None, exactly like the reference.
    module = EdgePrompt(args=None)
    out = module(batch_size=2)
    assert out is None

    print("KERNEL_OK")
</pallas_src>

<mosaic_0001>
module attributes {stable_mosaic.version = 11 : i64} {
  func.func @_copy_kernel(%arg0: i32, %arg1: i32, %arg2: memref<128x128xf32, #tpu.memory_space<vmem>>, %arg3: memref<128x128xf32, #tpu.memory_space<vmem>>) attributes {dimension_semantics = [#tpu.dimension_semantics<parallel>, #tpu.dimension_semantics<parallel>], iteration_bounds = array<i64: 2, 2>, scalar_prefetch = 0 : i64, scratch_operands = 0 : i64, tpu.core_type = #tpu.core_type<tc>, window_params = [{transform_indices = @transform_0, window_bounds = array<i64: 128, 128>}, {transform_indices = @transform_1, window_bounds = array<i64: 128, 128>}]} {
    %c0 = arith.constant 0 : index
    %c0_0 = arith.constant 0 : index
    %0 = vector.load %arg2[%c0, %c0_0] : memref<128x128xf32, #tpu.memory_space<vmem>>, vector<128x128xf32>
    %c0_1 = arith.constant 0 : index
    %c0_2 = arith.constant 0 : index
    %1 = vector.load %arg3[%c0_1, %c0_2] : memref<128x128xf32, #tpu.memory_space<vmem>>, vector<128x128xf32>
    tpu.vector_store %arg3[%c0_1, %c0_2], %0 {strides = array<i32>} : memref<128x128xf32, #tpu.memory_space<vmem>>, vector<128x128xf32>,
    return
  }
  func.func @transform_0(%arg0: i32, %arg1: i32) -> (i32, i32) {
    %c0_i32 = arith.constant 0 : i32
    return %arg0, %arg1 : i32, i32
  }
  func.func @transform_1(%arg0: i32, %arg1: i32) -> (i32, i32) {
    %c0_i32 = arith.constant 0 : i32
    return %arg0, %arg1 : i32, i32
  }
}

</mosaic_0001>

<bundles_post_ra>
// kernel: _edge_prompt_tiled_copy.1
= control target key start
LH: loop header
LB: loop body
LE: loop exit
PB: predicated region body
PF: predicated region fallthrough
CT: control target
= control target key end

     0   :  { %6 = vsyncpa [#allocation3], 0  ;;  %s774_s0 = inlined_call_operand.hbm [shape: f32[256,256], index: 0, kind: input, shape index: {}]   ;;  %s775_s1 = inlined_call_operand.hbm [shape: f32[256,256], index: 1, kind: output, shape index: {}]  }
   0x1   :  { %8 = vsyncpa [#allocation3 + $0x1], 0 }
   0x2   :  { %9 = vsyncpa [#allocation4], 0 }
   0x3   :  { %11 = vsyncpa [#allocation4 + $0x1], 0  ;;  %s542_s6 = smov 0   ;;  %s544_s7 = smov 0  }
   0x4   :  { %s546_s8 = smov 0   ;;  %s548_s9 = smov 0  }
   0x5   :  { %s550_s10 = smov 0   ;;  %s552_s11 = smov 0  }
   0x6   :  { %s554_s12 = smov 0   ;;  %s556_s13 = smov 0  }
   0x7 LB: > { %s291_s14 = sadd.s32 4294967295, %s522_s13   ;;  %s292_s15 = sadd.s32 4294967294, %s522_s13   ;;  %s522_s13 = sphi %s556_s13, %s17_s13   ;;  %s518_s12 = sphi %s554_s12, %s790_s12   ;;  %s514_s11 = sphi %s552_s11, %s789_s11   ;;  %s510_s10 = sphi %s550_s10, %s788_s10   ;;  %s506_s9 = sphi %s548_s9, %s787_s9   ;;  %s502_s8 = sphi %s546_s8, %s786_s8   ;;  %s498_s7 = sphi %s544_s7, %s785_s7   ;;  %s494_s6 = sphi %s542_s6, %s784_s6  }
   0x8   : > { %s26_s16 = sadd.s32 1, %s514_s11  ;;  %s29_s17 = sadd.s32 1, %s518_s12 }
   0x9   : > { %p27_p0 = scmp.ge.s32.totalorder %s26_s16, 2  ;;  %s38_s18 = sadd.s32 1, %s502_s8 }
   0xa   : > { %p45_p1 = scmp.ne.s32.totalorder %s502_s8, %s498_s7  ;;  %p46_p2 = scmp.eq.s32.totalorder %s522_s13, 0 }
   0xb   : > { %s792_s16 = smov (%p27_p0, %s26_s16), 0  ;;  %s794_s17 = smov (!%p27_p0, %s29_s17), %s518_s12 }
   0xc   : > { %s34_s19 = ssub.s32 %s514_s11, %s792_s16  ;;  %p595_p3 = por %p46_p2, %p45_p1 }
   0xd   : > { %p31_p4 = scmp.ge.s32.totalorder %s794_s17, 2  ;;  %p51_p5 = scmp.ne.s32.totalorder %s498_s7, %s494_s6 }
   0xe   : > { %p52_p6 = scmp.eq.s32.totalorder %s291_s14, 0  ;;  %p77_p7 = scmp.eq.s32.totalorder %s291_s14, 3 }
   0xf   : > { %s796_s17 = smov (%p31_p4, %s794_s17), 0  ;;  %p83_p10 = scmp.eq.s32.totalorder %s292_s15, 3 }
  0x10   : > { %p603_p8 = por %p52_p6, %p51_p5  ;;  %p607_p9 = por %p77_p7, %p45_p1 }
  0x11   : > { %s33_s23 = ssub.s32 %s518_s12, %s796_s17  ;;  %p613_p12 = por %p83_p10, %p51_p5 }
  0x12   : > { %s779_s22 = scalar_select %p607_p9, 1, 0 }
  0x13   : > { %s35_s24 = sor.u32 %s34_s19, %s33_s23  ;;  %p322_p13 = scmp.lt.s32.totalorder %s522_s13, 4 }
  0x14   : > { %p36_p11 = scmp.eq.s32.totalorder %s35_s24, 0  ;;  %s103_s26 = sand.u32 1, %s502_s8  }
  0x15   : > { %s780_s25 = scalar_select %p613_p12, 1, 0 }
  0x16   : > { %s620_s27 = scalar_select %p36_p11, %s502_s8, %s38_s18  }
  0x17   : > { %s295_s28 = sshll.u32 %s103_s26, 7  ;;  %s308_s29 = sshll.u32 %s518_s12, 5 }
  0x18   : > { %s113_s30 = sadd.s32 %s514_s11, %s308_s29  ;;  %s107_s2 = scalar_lea.vmem [#allocation2], %s295_s28 }
  0x19   : > { %s116_s3 = sshll.u32 %s107_s2, 4  ;;  %s298_s4 = sshll.u32 %s113_s30, 7  ;;  %s624_s3 = int_to_ptr.vmem [resolvable:$true] %s116_s3 }
  0x1a   : > { %s629_s15 = scalar_lea.hbm %s774_s0, %s298_s4  ;;  %p633_p0 = pnand %p322_p13, %p595_p3 }
  0x1b   : > { %s637_s19 = scalar_lea.sflag [#allocation3], %s103_s26  ;;  %s394_s23 = scalar_lea.hbm %s629_s15, 2048 }
  0x1c   : > { %p395_p1 = scmp.ne.s32.totalorder %s629_s15, %s394_s23  ;;  %p396_p2 = pneg %p633_p0 }
  0x1d   : > { %s399_s28 = scalar_lea.hbm %s774_s0, 8192  ;;  %p400_p3 = scmp.lt.u32.totalorder %s629_s15, %s774_s0 }
  0x1e   : > { %p397_p4 = pnand %p396_p2, %p395_p1  ;;  %p401_p6 = scmp.lt.u32.totalorder %s399_s28, %s394_s23 }
  0x1f   : > { %p403_p10 = scmp.lt.u32.totalorder %s394_s23, %s629_s15 }
  0x20   : > { %p398_p5 = pneg %p397_p4  ;;  %p402_p7 = por %p401_p6, %p400_p3 }
  0x22   : > { %p404_p11 = por %p403_p10, %p402_p7 }
  0x24   : > { %p405_p13 = pnand %p404_p11, %p398_p5 }
  0x26   : > { %408 = shalt.err (!%p405_p13)
}
  0x27   : > { %s409_s26 = scalar_lea.vmem %s624_s3, 2048  ;;  %s524_s2 = smov [#allocation2]  }
  0x28   : > { %p410_p1 = scmp.ne.s32.totalorder %s624_s3, %s409_s26  ;;  %s414_s4 = sshll.u32 %s524_s2, 4  ;;  %s415_s4 = int_to_ptr.vmem [resolvable:$false] %s414_s4 }
  0x29   : > { %s416_s5 = scalar_lea.vmem %s415_s4, 4096  ;;  %p417_p9 = scmp.lt.s32.totalorder %s624_s3, %s415_s4 }
  0x2a   : > { %p412_p4 = pnand %p410_p1, %p396_p2  ;;  %p418_p3 = scmp.lt.s32.totalorder %s416_s5, %s409_s26 }
  0x2c   : > { %p413_p12 = pneg %p412_p4  ;;  %p419_p6 = por %p418_p3, %p417_p9 }
  0x2e   : > { %p420_p7 = pnand %p419_p6, %p413_p12 }
  0x30   : > { %423 = shalt.err (!%p420_p7)
}
  0x31   : > { %s525_s14 = smov 256   ;;  %s526_s23 = smov 128  }
  0x32   : > { %s527_s20 = smov 8   ;;  %p299_p2 = scmp.ge.s32.totalorder %s522_s13, 1 }
  0x33   : > { %317 = dma.hbm_to_vmem [thread:$0]  (!%p633_p0), %s629_s15, 2048, %s624_s3, %s637_s19, %s525_s14, %s526_s23, %s527_s20  }
  0x34   : > { %p124_p5 = scmp.lt.s32.totalorder %s522_s13, 5 }
  0x36   : > { %p125_p10 = pnand %p299_p2, %p124_p5 }
  0x37   : > { %s668_s24 = sand.u32 (!%p125_p10), 1, %s498_s7  }
  0x38   : > { %128 = sbr.rel (%p125_p10) target bundleno = 93 (0x5d), region = 24  ;;  %s300_s28 = sshll.u32 (!%p125_p10), %s668_s24, 7 }
  0x39   : > { %s131_s29 = scalar_lea.sflag (!%p125_p10), [#allocation3], %s668_s24  ;;  %s672_s30 = scalar_lea.vmem (!%p125_p10), [#allocation2], %s300_s28 }
  0x3f   : > { %485 = dma.done.wait (%p603_p8), %s131_s29, 2048  }
  0x40   : > { %487 = vsyncadd (%p603_p8), %s131_s29, 4294965248  ;;  %s309_s3 = sshll.u32 %s510_s10, 5  ;;  %s680_s18 = scalar_lea.vmem [#allocation5], %s300_s28  ;;  %v155_v0 = vld [vmem:[%s672_s30] sm:$0xff]  ;;  %v156_v1 = vld [vmem:[%s672_s30 + $0x8] sm:$0xff] }
  0x41   : > { %s200_s15 = sadd.s32 %s506_s9, %s309_s3  ;;  %s203_s21 = sshll.u32 %s680_s18, 4  ;;  %v157_v2 = vld [vmem:[%s672_s30 + $0x10] sm:$0xff]  ;;  %171 = vst [vmem:[%s680_s18] sm:$0xff] %v155_v0  ;;  %172 = vst [vmem:[%s680_s18 + $0x8] sm:$0xff] %v156_v1  ;;  %v158_v3 = vld [vmem:[%s672_s30 + $0x18] sm:$0xff]  ;;  %s698_s21 = int_to_ptr.vmem [resolvable:$true] %s203_s21 }
  0x42   : > { %s305_s10 = sshll.u32 %s200_s15, 7  ;;  %173 = vst [vmem:[%s680_s18 + $0x10] sm:$0xff] %v157_v2  ;;  %v159_v4 = vld [vmem:[%s672_s30 + $0x20] sm:$0xff]  ;;  %v160_v5 = vld [vmem:[%s672_s30 + $0x28] sm:$0xff]  ;;  %174 = vst [vmem:[%s680_s18 + $0x18] sm:$0xff] %v158_v3  ;;  %s188_s2 = scalar_lea.sflag [#allocation4], %s668_s24 }
  0x43   : > { %175 = vst [vmem:[%s680_s18 + $0x20] sm:$0xff] %v159_v4  ;;  %176 = vst [vmem:[%s680_s18 + $0x28] sm:$0xff] %v160_v5  ;;  %v161_v6 = vld [vmem:[%s672_s30 + $0x30] sm:$0xff]  ;;  %v162_v7 = vld [vmem:[%s672_s30 + $0x38] sm:$0xff]  ;;  %s709_s26 = scalar_lea.hbm %s775_s1, %s305_s10  ;;  %s424_s4 = scalar_lea.vmem %s698_s21, 2048 }
  0x44   : > { %v163_v8 = vld [vmem:[%s672_s30 + $0x40] sm:$0xff]  ;;  %177 = vst [vmem:[%s680_s18 + $0x30] sm:$0xff] %v161_v6  ;;  %178 = vst [vmem:[%s680_s18 + $0x38] sm:$0xff] %v162_v7  ;;  %v164_v9 = vld [vmem:[%s672_s30 + $0x48] sm:$0xff]  ;;  %p425_p8 = scmp.ne.s32.totalorder %s698_s21, %s424_s4  ;;  %p782_p9 = scmp.ne.s32.totalorder %s779_s22, 0 }
  0x45   : > { %179 = vst [vmem:[%s680_s18 + $0x40] sm:$0xff] %v163_v8  ;;  %v165_v10 = vld [vmem:[%s672_s30 + $0x50] sm:$0xff]  ;;  %v166_v11 = vld [vmem:[%s672_s30 + $0x58] sm:$0xff]  ;;  %180 = vst [vmem:[%s680_s18 + $0x48] sm:$0xff] %v164_v9  ;;  %s528_s5 = smov [#allocation5]  }
  0x46   : > { %181 = vst [vmem:[%s680_s18 + $0x50] sm:$0xff] %v165_v10  ;;  %182 = vst [vmem:[%s680_s18 + $0x58] sm:$0xff] %v166_v11  ;;  %v167_v12 = vld [vmem:[%s672_s30 + $0x60] sm:$0xff]  ;;  %v168_v13 = vld [vmem:[%s672_s30 + $0x68] sm:$0xff]  ;;  %p426_p12 = pnand %p425_p8, %p782_p9  ;;  %s428_s14 = sshll.u32 %s528_s5, 4  ;;  %s429_s14 = int_to_ptr.vmem [resolvable:$false] %s428_s14 }
  0x47   : > { %v169_v14 = vld [vmem:[%s672_s30 + $0x70] sm:$0xff]  ;;  %183 = vst [vmem:[%s680_s18 + $0x60] sm:$0xff] %v167_v12  ;;  %184 = vst [vmem:[%s680_s18 + $0x68] sm:$0xff] %v168_v13  ;;  %v170_v15 = vld [vmem:[%s672_s30 + $0x78] sm:$0xff]  ;;  %s430_s23 = scalar_lea.vmem %s429_s14, 4096  ;;  %p431_p11 = scmp.lt.s32.totalorder %s698_s21, %s429_s14 }
  0x48   : > { %185 = vst [vmem:[%s680_s18 + $0x70] sm:$0xff] %v169_v14  ;;  %186 = vst [vmem:[%s680_s18 + $0x78] sm:$0xff] %v170_v15  ;;  %p427_p0 = pneg %p426_p12  ;;  %p432_p13 = scmp.lt.s32.totalorder %s430_s23, %s424_s4 }
  0x4a   : > { %p433_p1 = por %p432_p13, %p431_p11 }
  0x4c   : > { %p434_p4 = pnand %p433_p1, %p427_p0 }
  0x4e   : > { %437 = shalt.err (!%p434_p4)
}
  0x4f   : > { %s438_s20 = scalar_lea.hbm %s709_s26, 2048  ;;  %s442_s30 = scalar_lea.hbm %s775_s1, 8192 }
  0x50   : > { %p439_p3 = scmp.ne.s32.totalorder %s709_s26, %s438_s20  ;;  %p443_p2 = scmp.lt.u32.totalorder %s709_s26, %s775_s1 }
  0x51   : > { %p444_p5 = scmp.lt.u32.totalorder %s442_s30, %s438_s20  ;;  %p446_p8 = scmp.lt.u32.totalorder %s438_s20, %s709_s26 }
  0x52   : > { %p440_p6 = pnand %p439_p3, %p782_p9 }
  0x53   : > { %p445_p10 = por %p444_p5, %p443_p2 }
  0x54   : > { %p441_p7 = pneg %p440_p6 }
  0x55   : > { %p447_p12 = por %p446_p8, %p445_p10 }
  0x57   : > { %p448_p0 = pnand %p447_p12, %p441_p7 }
  0x59   : > { %451 = shalt.err (!%p448_p0)
}
  0x5a   : > { %s529_s18 = smov 128   ;;  %s530_s10 = smov 256  }
  0x5b   : > { %s531_s9 = smov 8  }
  0x5c   : > { %312 = dma.vmem_to_hbm [thread:$0]  (%p782_p9), %s698_s21, 2048, %s709_s26, %s188_s2, %s529_s18, %s530_s10, %s531_s9  }
  0x5d PF: > { %p323_p11 = scmp.ge.s32.totalorder %s522_s13, 2  ;;  %s218_s19 = sand.u32 1, %s494_s6  }
  0x5e   : > { %p783_p13 = scmp.ne.s32.totalorder %s780_s25, 0  ;;  %s219_s4 = scalar_lea.sflag [#allocation4], %s218_s19 }
  0x60   : > { %p319_p1 = pnand %p323_p11, %p783_p13 }
  0x62   : > { %489 = dma.done.wait (!%p319_p1), %s219_s4, 2048  }
  0x63   : > { %491 = vsyncadd (!%p319_p1), %s219_s4, 4294965248  ;;  %s17_s13 = sadd.s32 1, %s522_s13   ;;  %s784_s6 = smov %s498_s7 }
  0x64   : > { %p14_p4 = scmp.ge.s32.totalorder %s17_s13, 6   ;;  %s785_s7 = smov %s502_s8 }
  0x65   : > { %s786_s8 = smov %s620_s27  ;;  %s787_s9 = smov %s514_s11 }
  0x66   : > { %s788_s10 = smov %s518_s12  ;;  %s789_s11 = smov %s792_s16 }
  0x67   : > { %s790_s12 = smov %s796_s17  ;;  %16 = sbr.rel (!%p14_p4) target bundleno = 7 (0x7), region = 69 }
  0x6e   :  { %224 = vsyncpa [#allocation3], 1 }
  0x6f   :  { %226 = vsyncpa [#allocation3 + $0x1], 1 }
  0x70   :  { %227 = vsyncpa [#allocation4], 1 }
  0x71   :  { %229 = vsyncpa [#allocation4 + $0x1], 1 }

</bundles_post_ra>
